<compile_context>
chip_gen: v6e
topology: v6e:2x2x1
jax: 0.10.0
libtpu: 0.0.40
codegen_flags: <defaults>
</compile_context>

<pallas_src>
import functools
import math

import jax
import jax.numpy as jnp
from jax import lax
from jax.experimental import pallas as pl
from jax.experimental.pallas import tpu as pltpu


def _mednext_down_kernel(planes_ref, dw_ref, w2_ref, b2_ref, w3_ref,
                         wres_ref, bout_ref, out_ref, *,
                         taps, center, s, gn_eps):
    """One image per grid step.  planes_ref: (1, n_planes, C_in, hp*wo) bf16."""
    c_in = dw_ref.shape[1]

    # ---- conv1: depthwise stride-2 conv as a sum over contiguous tap slices -
    pi0, off0 = taps[0]
    acc = planes_ref[0, pi0, :, off0:off0 + s].astype(jnp.float32) * dw_ref[0]
    for t in range(1, len(taps)):
        pi, off = taps[t]
        acc = acc + (planes_ref[0, pi, :, off:off + s].astype(jnp.float32)
                     * dw_ref[t])
    # conv1 bias is intentionally omitted: GroupNorm(num_groups=C_in) subtracts
    # the per-channel mean, so a per-channel bias has no effect on the output.

    # ---- GroupNorm(num_groups=C_in) == per-channel instance norm (two-pass) -
    inv_s = 1.0 / s
    mean = jnp.sum(acc, axis=-1, keepdims=True) * inv_s          # (C_in, 1)
    cent = acc - mean
    var = jnp.sum(cent * cent, axis=-1, keepdims=True) * inv_s
    xn = cent * lax.rsqrt(var + gn_eps)                          # (C_in, S) f32
    # GN affine (gamma/beta) is folded into w2/b2 in the wrapper.

    # ---- conv2 (1x1 expand): one 2-D MXU matmul, S lanes wide ---------------
    h2 = jnp.dot(w2_ref[...], xn.astype(jnp.bfloat16),
                 preferred_element_type=jnp.float32) + b2_ref[...]
    # exact (erf) GELU, matching nn.GELU() default
    h2 = 0.5 * h2 * (1.0 + lax.erf(h2 * (1.0 / math.sqrt(2.0))))

    # ---- conv3 (1x1 compress): one 2-D MXU matmul ---------------------------
    h3 = jnp.dot(w3_ref[...], h2.astype(jnp.bfloat16),
                 preferred_element_type=jnp.float32)             # (C_out, S)

    # ---- res_conv: 1x1 stride conv on the ORIGINAL input (center tap) ------
    # K = C_in is tiny -> do it on the VPU in f32 (no MXU push, no extra bf16
    # rounding beyond the input's own bf16 cast).
    cpi, coff = center
    xc = planes_ref[0, cpi, :, coff:coff + s].astype(jnp.float32)  # (C_in, S)
    res = wres_ref[:, 0:1] * xc[0:1, :]
    for c in range(1, c_in):
        res = res + wres_ref[:, c:c + 1] * xc[c:c + 1, :]

    # bout = conv3 bias + res_conv bias (folded in the wrapper).
    out_ref[0] = (h3 + res + bout_ref[...]).astype(out_ref.dtype)


def mednext_down_block(x, params, *, stride=2, gn_eps=1e-5):
    """x: (N, C_in, H, W) float32 (PyTorch NCHW). Returns (N, C_out, Ho, Wo)."""
    n, c_in, h, w = x.shape
    conv1_w = params["conv1_w"]                      # (C_in, 1, kh, kw)
    kh, kw = int(conv1_w.shape[2]), int(conv1_w.shape[3])
    assert kh % 2 == 1 and kw % 2 == 1, "odd depthwise kernel expected"
    ph, pw = (kh - 1) // 2, (kw - 1) // 2
    st = stride
    ho = (h + 2 * ph - kh) // st + 1
    wo = (w + 2 * pw - kw) // st + 1
    # res_conv (kernel 1, stride=stride, padding 0) output must match conv1's.
    assert ho == (h - 1) // st + 1 and wo == (w - 1) // st + 1
    s = ho * wo
    c_mid = int(params["conv2_w"].shape[0])
    c_out = int(params["conv3_w"].shape[0])

    n_rpar = min(st, kh)                 # distinct row parities (2 for stride 2)
    max_roff = (kh - 1) // st            # max in-kernel row offset (1 for 3x3/s2)
    hp = ho + max_roff                   # plane rows
    n_planes = n_rpar * kw
    lp = hp * wo                         # flattened plane length

    # --- glue: row-parity x column-shift planes, bf16 (the HBM-heavy stream) -
    xb = x.astype(jnp.bfloat16)
    need_r = (n_rpar - 1) + st * (hp - 1) + 1
    need_c = (kw - 1) + st * (wo - 1) + 1
    extra_r = max(0, need_r - (h + 2 * ph))
    extra_c = max(0, need_c - (w + 2 * pw))
    xpad = jnp.pad(xb, ((0, 0), (0, 0), (ph, ph + extra_r), (pw, pw + extra_c)))
    plane_list = []
    for p in range(n_rpar):
        for j in range(kw):
            sl = xpad[:, :, p:p + st * (hp - 1) + 1:st,
                      j:j + st * (wo - 1) + 1:st]        # (N, C_in, hp, wo)
            plane_list.append(sl.reshape(n, c_in, lp))
    planes = jnp.stack(plane_list, axis=1)               # (N, n_planes, C_in, lp)

    # Static tap table: tap (i, j) -> (plane index, lane offset inside plane).
    taps = tuple(((i % st) * kw + j, (i // st) * wo)
                 for i in range(kh) for j in range(kw))
    center = ((ph % st) * kw + pw, (ph // st) * wo)      # reads x[:, ::st, ::st]

    # --- glue: parameter folding (exact, done once in f32) -------------------
    dw = (jnp.transpose(conv1_w[:, 0], (1, 2, 0))
          .reshape(kh * kw, c_in)[..., None].astype(jnp.float32))  # (T, C_in, 1)
    w2f = params["conv2_w"][:, :, 0, 0].astype(jnp.float32)        # (C_mid, C_in)
    gnw = params["gn_w"].astype(jnp.float32)
    gnb = params["gn_b"].astype(jnp.float32)
    w2_eff = (w2f * gnw[None, :]).astype(jnp.bfloat16)             # GN gamma fold
    b2_eff = (params["conv2_b"].astype(jnp.float32)
              + w2f @ gnb).reshape(c_mid, 1)                       # GN beta fold
    w3 = params["conv3_w"][:, :, 0, 0].astype(jnp.bfloat16)        # (C_out, C_mid)
    wres = params["res_w"][:, :, 0, 0].astype(jnp.float32)         # (C_out, C_in)
    b_out = (params["conv3_b"].astype(jnp.float32)
             + params["res_b"].astype(jnp.float32)).reshape(c_out, 1)

    kernel = functools.partial(_mednext_down_kernel, taps=taps, center=center,
                               s=s, gn_eps=gn_eps)

    # --- generation-aware VMEM budget ----------------------------------------
    try:
        vmem_cap = int(pltpu.get_tpu_info().vmem_capacity_bytes)
    except Exception:  # pragma: no cover - conservative fallback
        vmem_cap = 128 * 2**20
    budget = int(0.75 * vmem_cap)        # ~48 MiB on v7x, ~96 MiB on v5e/v6e
    step_bytes = (n_planes * c_in * lp * 2            # bf16 plane block
                  + c_out * s * 4                     # output block
                  + (2 * c_in + 2 * c_mid + 2 * c_out) * s * 4)  # live f32 temps
    vmem_limit = int(min(budget, max(16 * 2**20, 8 * step_bytes)))

    flops = n * (2 * kh * kw * c_in * s
                 + 2 * s * (c_in * c_mid + c_mid * c_out + c_in * c_out)
                 + 10 * c_in * s)
    bytes_accessed = (n * n_planes * c_in * lp * 2 + n * c_out * s * 4
                      + (kh * kw * c_in + c_mid * c_in + c_out * c_mid
                         + c_out * c_in + c_mid + c_out) * 4)
    cost = pl.CostEstimate(flops=int(flops), transcendentals=int(n * c_mid * s),
                           bytes_accessed=int(bytes_accessed))

    # One image per grid step: GroupNorm stays per-image exact, grid has N >= 2
    # steps (pipelined DMA + megacore-shardable), and at realistic MedNeXt
    # sizes S = Ho*Wo is a multiple of 128 so matmuls/stores are lane-dense.
    out = pl.pallas_call(
        kernel,
        out_shape=jax.ShapeDtypeStruct((n, c_out, s), jnp.float32),
        grid_spec=pltpu.PrefetchScalarGridSpec(
            num_scalar_prefetch=0,
            grid=(n,),
            in_specs=[
                pl.BlockSpec((1, n_planes, c_in, lp), lambda b: (b, 0, 0, 0)),
                pl.BlockSpec((kh * kw, c_in, 1), lambda b: (0, 0, 0)),
                pl.BlockSpec((c_mid, c_in), lambda b: (0, 0)),
                pl.BlockSpec((c_mid, 1), lambda b: (0, 0)),
                pl.BlockSpec((c_out, c_mid), lambda b: (0, 0)),
                pl.BlockSpec((c_out, c_in), lambda b: (0, 0)),
                pl.BlockSpec((c_out, 1), lambda b: (0, 0)),
            ],
            out_specs=pl.BlockSpec((1, c_out, s), lambda b: (b, 0, 0)),
        ),
        compiler_params=pltpu.CompilerParams(
            dimension_semantics=("parallel",),
            vmem_limit_bytes=vmem_limit),
        cost_estimate=cost,
    )(planes, dw, w2_eff, b2_eff, w3, wres, b_out)

    return out.reshape(n, c_out, ho, wo)


# ---------------------------- reference & setup ------------------------------

def _init_params(key, c_in, c_out, exp_r, conv_kernel_size):
    kh, kw = conv_kernel_size
    c_mid = exp_r * c_in
    ks = jax.random.split(key, 10)
    s = 0.1
    return {
        "conv1_w": s * jax.random.normal(ks[0], (c_in, 1, kh, kw), jnp.float32),
        "conv1_b": s * jax.random.normal(ks[1], (c_in,), jnp.float32),
        "gn_w": 1.0 + s * jax.random.normal(ks[2], (c_in,), jnp.float32),
        "gn_b": s * jax.random.normal(ks[3], (c_in,), jnp.float32),
        "conv2_w": s * jax.random.normal(ks[4], (c_mid, c_in, 1, 1), jnp.float32),
        "conv2_b": s * jax.random.normal(ks[5], (c_mid,), jnp.float32),
        "conv3_w": s * jax.random.normal(ks[6], (c_out, c_mid, 1, 1), jnp.float32),
        "conv3_b": s * jax.random.normal(ks[7], (c_out,), jnp.float32),
        "res_w": s * jax.random.normal(ks[8], (c_out, c_in, 1, 1), jnp.float32),
        "res_b": s * jax.random.normal(ks[9], (c_out,), jnp.float32),
    }


def _reference(x, p, *, stride=2, gn_eps=1e-5):
    """Pure-JAX re-statement of MedNeXtDownBlock.forward (do_res=True, grn=False)."""
    c_in = x.shape[1]
    kh, kw = p["conv1_w"].shape[2:]
    pad_h, pad_w = (kh - 1) // 2, (kw - 1) // 2
    x1 = lax.conv_general_dilated(
        x, p["conv1_w"], (stride, stride), [(pad_h, pad_h), (pad_w, pad_w)],
        dimension_numbers=("NCHW", "OIHW", "NCHW"), feature_group_count=c_in)
    x1 = x1 + p["conv1_b"][None, :, None, None]
    mean = x1.mean(axis=(2, 3), keepdims=True)
    var = ((x1 - mean) ** 2).mean(axis=(2, 3), keepdims=True)
    xn = (x1 - mean) / jnp.sqrt(var + gn_eps)
    xn = xn * p["gn_w"][None, :, None, None] + p["gn_b"][None, :, None, None]
    h = jnp.einsum("nchw,mc->nmhw", xn, p["conv2_w"][:, :, 0, 0]) \
        + p["conv2_b"][None, :, None, None]
    h = jax.nn.gelu(h, approximate=False)
    h3 = jnp.einsum("nchw,mc->nmhw", h, p["conv3_w"][:, :, 0, 0]) \
        + p["conv3_b"][None, :, None, None]
    res = jnp.einsum("nchw,mc->nmhw", x[:, :, ::stride, ::stride],
                     p["res_w"][:, :, 0, 0]) + p["res_b"][None, :, None, None]
    return h3 + res


if __name__ == "__main__":
    key = jax.random.PRNGKey(0)
    kx, kp = jax.random.split(key)

    # MedNeXtDownBlock(in_channels=4, out_channels=8, conv_op=nn.Conv2d,
    #                  conv_kernel_size=(3, 3), stride=2, conv_bias=True,
    #                  exp_r=4, do_res=True, norm_type='group', grn=False)
    N, C_in, H, W = 2, 4, 16, 16
    exp_r, C_out = 4, 8
    conv_kernel_size = (3, 3)

    x = jax.random.normal(kx, (N, C_in, H, W), jnp.float32)
    params = _init_params(kp, C_in, C_out, exp_r, conv_kernel_size)

    out = mednext_down_block(x, params, stride=2)
    out = jax.block_until_ready(out)

    ref = _reference(x, params, stride=2)
    assert out.shape == ref.shape, (out.shape, ref.shape)
    err = float(jnp.max(jnp.abs(out - ref)))
    # Tolerance accounts for bf16 input planes + bf16 MXU operands in the two
    # 1x1 convs (f32 accumulation everywhere; res path is f32 on the VPU).
    if err > 2e-2:
        raise AssertionError(f"max abs error too large: {err}")
    print("KERNEL_OK")
</pallas_src>

<mosaic_0001>
module attributes {stable_mosaic.version = 11 : i64} {
  func.func @_mednext_down_kernel(%arg0: i32, %arg1: memref<1x6x4x72xbf16, #tpu.memory_space<vmem>>, %arg2: memref<9x4x1xf32, #tpu.memory_space<vmem>>, %arg3: memref<16x4xbf16, #tpu.memory_space<vmem>>, %arg4: memref<16x1xf32, #tpu.memory_space<vmem>>, %arg5: memref<8x16xbf16, #tpu.memory_space<vmem>>, %arg6: memref<8x4xf32, #tpu.memory_space<vmem>>, %arg7: memref<8x1xf32, #tpu.memory_space<vmem>>, %arg8: memref<1x8x64xf32, #tpu.memory_space<vmem>>) attributes {dimension_semantics = [#tpu.dimension_semantics<parallel>], iteration_bounds = array<i64: 2>, scalar_prefetch = 0 : i64, scratch_operands = 0 : i64, tpu.core_type = #tpu.core_type<tc>, window_params = [{transform_indices = @transform_0, window_bounds = array<i64: 1, 6, 4, 72>}, {pipeline_mode = #tpu.pipeline_mode<synchronous>, transform_indices = @transform_1, window_bounds = array<i64: 9, 4, 1>}, {pipeline_mode = #tpu.pipeline_mode<synchronous>, transform_indices = @transform_2, window_bounds = array<i64: 16, 4>}, {pipeline_mode = #tpu.pipeline_mode<synchronous>, transform_indices = @transform_3, window_bounds = array<i64: 16, 1>}, {pipeline_mode = #tpu.pipeline_mode<synchronous>, transform_indices = @transform_4, window_bounds = array<i64: 8, 16>}, {pipeline_mode = #tpu.pipeline_mode<synchronous>, transform_indices = @transform_5, window_bounds = array<i64: 8, 4>}, {pipeline_mode = #tpu.pipeline_mode<synchronous>, transform_indices = @transform_6, window_bounds = array<i64: 8, 1>}, {transform_indices = @transform_7, window_bounds = array<i64: 1, 8, 64>}]} {
    %c0 = arith.constant 0 : index
    %c0_0 = arith.constant 0 : index
    %c0_1 = arith.constant 0 : index
    %c0_2 = arith.constant 0 : index
    %0 = vector.load %arg1[%c0, %c0_0, %c0_1, %c0_2] : memref<1x6x4x72xbf16, #tpu.memory_space<vmem>>, vector<1x1x4x64xbf16>
    %1 = vector.shape_cast %0 : vector<1x1x4x64xbf16> to vector<4x64xbf16>
    %2 = arith.extf %1 : vector<4x64xbf16> to vector<4x64xf32>
    %c0_3 = arith.constant 0 : index
    %c0_4 = arith.constant 0 : index
    %c0_5 = arith.constant 0 : index
    %3 = vector.load %arg2[%c0_3, %c0_4, %c0_5] : memref<9x4x1xf32, #tpu.memory_space<vmem>>, vector<1x4x1xf32>
    %4 = vector.shape_cast %3 : vector<1x4x1xf32> to vector<4x1xf32>
    %5 = vector.broadcast %4 : vector<4x1xf32> to vector<4x64xf32>
    %6 = arith.mulf %2, %5 : vector<4x64xf32>
    %c0_6 = arith.constant 0 : index
    %c1 = arith.constant 1 : index
    %c0_7 = arith.constant 0 : index
    %c0_8 = arith.constant 0 : index
    %7 = vector.load %arg1[%c0_6, %c1, %c0_7, %c0_8] : memref<1x6x4x72xbf16, #tpu.memory_space<vmem>>, vector<1x1x4x64xbf16>
    %8 = vector.shape_cast %7 : vector<1x1x4x64xbf16> to vector<4x64xbf16>
    %9 = arith.extf %8 : vector<4x64xbf16> to vector<4x64xf32>
    %c1_9 = arith.constant 1 : index
    %c0_10 = arith.constant 0 : index
    %c0_11 = arith.constant 0 : index
    %10 = vector.load %arg2[%c1_9, %c0_10, %c0_11] : memref<9x4x1xf32, #tpu.memory_space<vmem>>, vector<1x4x1xf32>
    %11 = vector.shape_cast %10 : vector<1x4x1xf32> to vector<4x1xf32>
    %12 = vector.broadcast %11 : vector<4x1xf32> to vector<4x64xf32>
    %13 = arith.mulf %9, %12 : vector<4x64xf32>
    %14 = arith.addf %6, %13 : vector<4x64xf32>
    %c0_12 = arith.constant 0 : index
    %c2 = arith.constant 2 : index
    %c0_13 = arith.constant 0 : index
    %c0_14 = arith.constant 0 : index
    %15 = vector.load %arg1[%c0_12, %c2, %c0_13, %c0_14] : memref<1x6x4x72xbf16, #tpu.memory_space<vmem>>, vector<1x1x4x64xbf16>
    %16 = vector.shape_cast %15 : vector<1x1x4x64xbf16> to vector<4x64xbf16>
    %17 = arith.extf %16 : vector<4x64xbf16> to vector<4x64xf32>
    %c2_15 = arith.constant 2 : index
    %c0_16 = arith.constant 0 : index
    %c0_17 = arith.constant 0 : index
    %18 = vector.load %arg2[%c2_15, %c0_16, %c0_17] : memref<9x4x1xf32, #tpu.memory_space<vmem>>, vector<1x4x1xf32>
    %19 = vector.shape_cast %18 : vector<1x4x1xf32> to vector<4x1xf32>
    %20 = vector.broadcast %19 : vector<4x1xf32> to vector<4x64xf32>
    %21 = arith.mulf %17, %20 : vector<4x64xf32>
    %22 = arith.addf %14, %21 : vector<4x64xf32>
    %c0_18 = arith.constant 0 : index
    %c3 = arith.constant 3 : index
    %c0_19 = arith.constant 0 : index
    %c0_20 = arith.constant 0 : index
    %23 = vector.load %arg1[%c0_18, %c3, %c0_19, %c0_20] : memref<1x6x4x72xbf16, #tpu.memory_space<vmem>>, vector<1x1x4x64xbf16>
    %24 = vector.shape_cast %23 : vector<1x1x4x64xbf16> to vector<4x64xbf16>
    %25 = arith.extf %24 : vector<4x64xbf16> to vector<4x64xf32>
    %c3_21 = arith.constant 3 : index
    %c0_22 = arith.constant 0 : index
    %c0_23 = arith.constant 0 : index
    %26 = vector.load %arg2[%c3_21, %c0_22, %c0_23] : memref<9x4x1xf32, #tpu.memory_space<vmem>>, vector<1x4x1xf32>
    %27 = vector.shape_cast %26 : vector<1x4x1xf32> to vector<4x1xf32>
    %28 = vector.broadcast %27 : vector<4x1xf32> to vector<4x64xf32>
    %29 = arith.mulf %25, %28 : vector<4x64xf32>
    %30 = arith.addf %22, %29 : vector<4x64xf32>
    %c0_24 = arith.constant 0 : index
    %c4 = arith.constant 4 : index
    %c0_25 = arith.constant 0 : index
    %c0_26 = arith.constant 0 : index
    %31 = vector.load %arg1[%c0_24, %c4, %c0_25, %c0_26] : memref<1x6x4x72xbf16, #tpu.memory_space<vmem>>, vector<1x1x4x64xbf16>
    %32 = vector.shape_cast %31 : vector<1x1x4x64xbf16> to vector<4x64xbf16>
    %33 = arith.extf %32 : vector<4x64xbf16> to vector<4x64xf32>
    %c4_27 = arith.constant 4 : index
    %c0_28 = arith.constant 0 : index
    %c0_29 = arith.constant 0 : index
    %34 = vector.load %arg2[%c4_27, %c0_28, %c0_29] : memref<9x4x1xf32, #tpu.memory_space<vmem>>, vector<1x4x1xf32>
    %35 = vector.shape_cast %34 : vector<1x4x1xf32> to vector<4x1xf32>
    %36 = vector.broadcast %35 : vector<4x1xf32> to vector<4x64xf32>
    %37 = arith.mulf %33, %36 : vector<4x64xf32>
    %38 = arith.addf %30, %37 : vector<4x64xf32>
    %c0_30 = arith.constant 0 : index
    %c5 = arith.constant 5 : index
    %c0_31 = arith.constant 0 : index
    %c0_32 = arith.constant 0 : index
    %39 = vector.load %arg1[%c0_30, %c5, %c0_31, %c0_32] : memref<1x6x4x72xbf16, #tpu.memory_space<vmem>>, vector<1x1x4x64xbf16>
    %40 = vector.shape_cast %39 : vector<1x1x4x64xbf16> to vector<4x64xbf16>
    %41 = arith.extf %40 : vector<4x64xbf16> to vector<4x64xf32>
    %c5_33 = arith.constant 5 : index
    %c0_34 = arith.constant 0 : index
    %c0_35 = arith.constant 0 : index
    %42 = vector.load %arg2[%c5_33, %c0_34, %c0_35] : memref<9x4x1xf32, #tpu.memory_space<vmem>>, vector<1x4x1xf32>
    %43 = vector.shape_cast %42 : vector<1x4x1xf32> to vector<4x1xf32>
    %44 = vector.broadcast %43 : vector<4x1xf32> to vector<4x64xf32>
    %45 = arith.mulf %41, %44 : vector<4x64xf32>
    %46 = arith.addf %38, %45 : vector<4x64xf32>
    %c0_36 = arith.constant 0 : index
    %c0_37 = arith.constant 0 : index
    %c0_38 = arith.constant 0 : index
    %c8 = arith.constant 8 : index
    %47 = vector.load %arg1[%c0_36, %c0_37, %c0_38, %c8] : memref<1x6x4x72xbf16, #tpu.memory_space<vmem>>, vector<1x1x4x64xbf16>
    %48 = vector.shape_cast %47 : vector<1x1x4x64xbf16> to vector<4x64xbf16>
    %49 = arith.extf %48 : vector<4x64xbf16> to vector<4x64xf32>
    %c6 = arith.constant 6 : index
    %c0_39 = arith.constant 0 : index
    %c0_40 = arith.constant 0 : index
    %50 = vector.load %arg2[%c6, %c0_39, %c0_40] : memref<9x4x1xf32, #tpu.memory_space<vmem>>, vector<1x4x1xf32>
    %51 = vector.shape_cast %50 : vector<1x4x1xf32> to vector<4x1xf32>
    %52 = vector.broadcast %51 : vector<4x1xf32> to vector<4x64xf32>
    %53 = arith.mulf %49, %52 : vector<4x64xf32>
    %54 = arith.addf %46, %53 : vector<4x64xf32>
    %c0_41 = arith.constant 0 : index
    %c1_42 = arith.constant 1 : index
    %c0_43 = arith.constant 0 : index
    %c8_44 = arith.constant 8 : index
    %55 = vector.load %arg1[%c0_41, %c1_42, %c0_43, %c8_44] : memref<1x6x4x72xbf16, #tpu.memory_space<vmem>>, vector<1x1x4x64xbf16>
    %56 = vector.shape_cast %55 : vector<1x1x4x64xbf16> to vector<4x64xbf16>
    %57 = arith.extf %56 : vector<4x64xbf16> to vector<4x64xf32>
    %c7 = arith.constant 7 : index
    %c0_45 = arith.constant 0 : index
    %c0_46 = arith.constant 0 : index
    %58 = vector.load %arg2[%c7, %c0_45, %c0_46] : memref<9x4x1xf32, #tpu.memory_space<vmem>>, vector<1x4x1xf32>
    %59 = vector.shape_cast %58 : vector<1x4x1xf32> to vector<4x1xf32>
    %60 = vector.broadcast %59 : vector<4x1xf32> to vector<4x64xf32>
    %61 = arith.mulf %57, %60 : vector<4x64xf32>
    %62 = arith.addf %54, %61 : vector<4x64xf32>
    %c0_47 = arith.constant 0 : index
    %c2_48 = arith.constant 2 : index
    %c0_49 = arith.constant 0 : index
    %c8_50 = arith.constant 8 : index
    %63 = vector.load %arg1[%c0_47, %c2_48, %c0_49, %c8_50] : memref<1x6x4x72xbf16, #tpu.memory_space<vmem>>, vector<1x1x4x64xbf16>
    %64 = vector.shape_cast %63 : vector<1x1x4x64xbf16> to vector<4x64xbf16>
    %65 = arith.extf %64 : vector<4x64xbf16> to vector<4x64xf32>
    %c8_51 = arith.constant 8 : index
    %c0_52 = arith.constant 0 : index
    %c0_53 = arith.constant 0 : index
    %66 = vector.load %arg2[%c8_51, %c0_52, %c0_53] : memref<9x4x1xf32, #tpu.memory_space<vmem>>, vector<1x4x1xf32>
    %67 = vector.shape_cast %66 : vector<1x4x1xf32> to vector<4x1xf32>
    %68 = vector.broadcast %67 : vector<4x1xf32> to vector<4x64xf32>
    %69 = arith.mulf %65, %68 : vector<4x64xf32>
    %70 = arith.addf %62, %69 : vector<4x64xf32>
    %cst = arith.constant dense<0.000000e+00> : vector<4xf32>
    %71 = vector.multi_reduction <add>, %70, %cst [1] : vector<4x64xf32> to vector<4xf32>
    %72 = vector.shape_cast %71 : vector<4xf32> to vector<4x1xf32>
    %cst_54 = arith.constant 1.562500e-02 : f32
    %73 = vector.broadcast %cst_54 : f32 to vector<4x1xf32>
    %74 = arith.mulf %72, %73 : vector<4x1xf32>
    %75 = vector.broadcast %74 : vector<4x1xf32> to vector<4x64xf32>
    %76 = arith.subf %70, %75 : vector<4x64xf32>
    %77 = arith.mulf %76, %76 : vector<4x64xf32>
    %cst_55 = arith.constant dense<0.000000e+00> : vector<4xf32>
    %78 = vector.multi_reduction <add>, %77, %cst_55 [1] : vector<4x64xf32> to vector<4xf32>
    %79 = vector.shape_cast %78 : vector<4xf32> to vector<4x1xf32>
    %cst_56 = arith.constant 1.562500e-02 : f32
    %80 = vector.broadcast %cst_56 : f32 to vector<4x1xf32>
    %81 = arith.mulf %79, %80 : vector<4x1xf32>
    %cst_57 = arith.constant 9.99999974E-6 : f32
    %82 = vector.broadcast %cst_57 : f32 to vector<4x1xf32>
    %83 = arith.addf %81, %82 : vector<4x1xf32>
    %84 = math.rsqrt %83 : vector<4x1xf32>
    %85 = vector.broadcast %84 : vector<4x1xf32> to vector<4x64xf32>
    %86 = arith.mulf %76, %85 : vector<4x64xf32>
    %c0_58 = arith.constant 0 : index
    %c0_59 = arith.constant 0 : index
    %87 = vector.load %arg3[%c0_58, %c0_59] : memref<16x4xbf16, #tpu.memory_space<vmem>>, vector<16x4xbf16>
    %88 = arith.truncf %86 : vector<4x64xf32> to vector<4x64xbf16>
    %cst_60 = arith.constant dense<0.000000e+00> : vector<16x64xf32>
    %89 = tpu.matmul %87, %88, %cst_60 {dimension_numbers = #tpu.dot_dimension_numbers<[1], [0], [0], [1], [0, 0, 1, 1], [], []>} : vector<16x4xbf16>, vector<4x64xbf16>, vector<16x64xf32> -> vector<16x64xf32>
    %c0_61 = arith.constant 0 : index
    %c0_62 = arith.constant 0 : index
    %90 = vector.load %arg4[%c0_61, %c0_62] : memref<16x1xf32, #tpu.memory_space<vmem>>, vector<16x1xf32>
    %91 = vector.broadcast %90 : vector<16x1xf32> to vector<16x64xf32>
    %92 = arith.addf %89, %91 : vector<16x64xf32>
    %cst_63 = arith.constant 5.000000e-01 : f32
    %93 = vector.broadcast %cst_63 : f32 to vector<16x64xf32>
    %94 = arith.mulf %93, %92 : vector<16x64xf32>
    %cst_64 = arith.constant 0.707106769 : f32
    %95 = vector.broadcast %cst_64 : f32 to vector<16x64xf32>
    %96 = arith.mulf %92, %95 : vector<16x64xf32>
    %97 = math.erf %96 : vector<16x64xf32>
    %cst_65 = arith.constant 1.000000e+00 : f32
    %98 = vector.broadcast %cst_65 : f32 to vector<16x64xf32>
    %99 = arith.addf %98, %97 : vector<16x64xf32>
    %100 = arith.mulf %94, %99 : vector<16x64xf32>
    %c0_66 = arith.constant 0 : index
    %c0_67 = arith.constant 0 : index
    %101 = vector.load %arg5[%c0_66, %c0_67] : memref<8x16xbf16, #tpu.memory_space<vmem>>, vector<8x16xbf16>
    %102 = arith.truncf %100 : vector<16x64xf32> to vector<16x64xbf16>
    %cst_68 = arith.constant dense<0.000000e+00> : vector<8x64xf32>
    %103 = tpu.matmul %101, %102, %cst_68 {dimension_numbers = #tpu.dot_dimension_numbers<[1], [0], [0], [1], [0, 0, 1, 1], [], []>} : vector<8x16xbf16>, vector<16x64xbf16>, vector<8x64xf32> -> vector<8x64xf32>
    %c0_69 = arith.constant 0 : index
    %c4_70 = arith.constant 4 : index
    %c0_71 = arith.constant 0 : index
    %c0_72 = arith.constant 0 : index
    %104 = vector.load %arg1[%c0_69, %c4_70, %c0_71, %c0_72] : memref<1x6x4x72xbf16, #tpu.memory_space<vmem>>, vector<1x1x4x64xbf16>
    %105 = vector.shape_cast %104 : vector<1x1x4x64xbf16> to vector<4x64xbf16>
    %106 = arith.extf %105 : vector<4x64xbf16> to vector<4x64xf32>
    %c0_73 = arith.constant 0 : index
    %c0_74 = arith.constant 0 : index
    %107 = vector.load %arg6[%c0_73, %c0_74] : memref<8x4xf32, #tpu.memory_space<vmem>>, vector<8x1xf32>
    %108 = vector.extract_strided_slice %106 {offsets = [0, 0], sizes = [1, 64], strides = [1, 1]} : vector<4x64xf32> to vector<1x64xf32>
    %109 = vector.broadcast %107 : vector<8x1xf32> to vector<8x64xf32>
    %110 = vector.broadcast %108 : vector<1x64xf32> to vector<8x64xf32>
    %111 = arith.mulf %109, %110 : vector<8x64xf32>
    %c0_75 = arith.constant 0 : index
    %c1_76 = arith.constant 1 : index
    %112 = vector.load %arg6[%c0_75, %c1_76] : memref<8x4xf32, #tpu.memory_space<vmem>>, vector<8x1xf32>
    %113 = vector.extract_strided_slice %106 {offsets = [1, 0], sizes = [1, 64], strides = [1, 1]} : vector<4x64xf32> to vector<1x64xf32>
    %114 = vector.broadcast %112 : vector<8x1xf32> to vector<8x64xf32>
    %115 = vector.broadcast %113 : vector<1x64xf32> to vector<8x64xf32>
    %116 = arith.mulf %114, %115 : vector<8x64xf32>
    %117 = arith.addf %111, %116 : vector<8x64xf32>
    %c0_77 = arith.constant 0 : index
    %c2_78 = arith.constant 2 : index
    %118 = vector.load %arg6[%c0_77, %c2_78] : memref<8x4xf32, #tpu.memory_space<vmem>>, vector<8x1xf32>
    %119 = vector.extract_strided_slice %106 {offsets = [2, 0], sizes = [1, 64], strides = [1, 1]} : vector<4x64xf32> to vector<1x64xf32>
    %120 = vector.broadcast %118 : vector<8x1xf32> to vector<8x64xf32>
    %121 = vector.broadcast %119 : vector<1x64xf32> to vector<8x64xf32>
    %122 = arith.mulf %120, %121 : vector<8x64xf32>
    %123 = arith.addf %117, %122 : vector<8x64xf32>
    %c0_79 = arith.constant 0 : index
    %c3_80 = arith.constant 3 : index
    %124 = vector.load %arg6[%c0_79, %c3_80] : memref<8x4xf32, #tpu.memory_space<vmem>>, vector<8x1xf32>
    %125 = vector.extract_strided_slice %106 {offsets = [3, 0], sizes = [1, 64], strides = [1, 1]} : vector<4x64xf32> to vector<1x64xf32>
    %126 = vector.broadcast %124 : vector<8x1xf32> to vector<8x64xf32>
    %127 = vector.broadcast %125 : vector<1x64xf32> to vector<8x64xf32>
    %128 = arith.mulf %126, %127 : vector<8x64xf32>
    %129 = arith.addf %123, %128 : vector<8x64xf32>
    %130 = arith.addf %103, %129 : vector<8x64xf32>
    %c0_81 = arith.constant 0 : index
    %c0_82 = arith.constant 0 : index
    %131 = vector.load %arg7[%c0_81, %c0_82] : memref<8x1xf32, #tpu.memory_space<vmem>>, vector<8x1xf32>
    %132 = vector.broadcast %131 : vector<8x1xf32> to vector<8x64xf32>
    %133 = arith.addf %130, %132 : vector<8x64xf32>
    %c0_83 = arith.constant 0 : index
    %c0_84 = arith.constant 0 : index
    %c0_85 = arith.constant 0 : index
    %134 = vector.load %arg8[%c0_83, %c0_84, %c0_85] : memref<1x8x64xf32, #tpu.memory_space<vmem>>, vector<1x8x64xf32>
    %135 = vector.shape_cast %134 : vector<1x8x64xf32> to vector<8x64xf32>
    %136 = vector.shape_cast %133 : vector<8x64xf32> to vector<1x8x64xf32>
    tpu.vector_store %arg8[%c0_83, %c0_84, %c0_85], %136 {strides = array<i32>} : memref<1x8x64xf32, #tpu.memory_space<vmem>>, vector<1x8x64xf32>,
    return
  }
  func.func @transform_0(%arg0: i32) -> (i32, i32, i32, i32) {
    %c0_i32 = arith.constant 0 : i32
    %c0_i32_0 = arith.constant 0 : i32
    %c0_i32_1 = arith.constant 0 : i32
    %c0_i32_2 = arith.constant 0 : i32
    return %arg0, %c0_i32, %c0_i32_0, %c0_i32_1 : i32, i32, i32, i32
  }
  func.func @transform_1(%arg0: i32) -> (i32, i32, i32) {
    %c0_i32 = arith.constant 0 : i32
    %c0_i32_0 = arith.constant 0 : i32
    %c0_i32_1 = arith.constant 0 : i32
    %c0_i32_2 = arith.constant 0 : i32
    return %c0_i32, %c0_i32_0, %c0_i32_1 : i32, i32, i32
  }
  func.func @transform_2(%arg0: i32) -> (i32, i32) {
    %c0_i32 = arith.constant 0 : i32
    %c0_i32_0 = arith.constant 0 : i32
    %c0_i32_1 = arith.constant 0 : i32
    return %c0_i32, %c0_i32_0 : i32, i32
  }
  func.func @transform_3(%arg0: i32) -> (i32, i32) {
    %c0_i32 = arith.constant 0 : i32
    %c0_i32_0 = arith.constant 0 : i32
    %c0_i32_1 = arith.constant 0 : i32
    return %c0_i32, %c0_i32_0 : i32, i32
  }
  func.func @transform_4(%arg0: i32) -> (i32, i32) {
    %c0_i32 = arith.constant 0 : i32
    %c0_i32_0 = arith.constant 0 : i32
    %c0_i32_1 = arith.constant 0 : i32
    return %c0_i32, %c0_i32_0 : i32, i32
  }
  func.func @transform_5(%arg0: i32) -> (i32, i32) {
    %c0_i32 = arith.constant 0 : i32
    %c0_i32_0 = arith.constant 0 : i32
    %c0_i32_1 = arith.constant 0 : i32
    return %c0_i32, %c0_i32_0 : i32, i32
  }
  func.func @transform_6(%arg0: i32) -> (i32, i32) {
    %c0_i32 = arith.constant 0 : i32
    %c0_i32_0 = arith.constant 0 : i32
    %c0_i32_1 = arith.constant 0 : i32
    return %c0_i32, %c0_i32_0 : i32, i32
  }
  func.func @transform_7(%arg0: i32) -> (i32, i32, i32) {
    %c0_i32 = arith.constant 0 : i32
    %c0_i32_0 = arith.constant 0 : i32
    %c0_i32_1 = arith.constant 0 : i32
    return %arg0, %c0_i32, %c0_i32_0 : i32, i32, i32
  }
}

</mosaic_0001>

<bundles_post_ra>
// kernel: tpu_custom_call.1
= control target key start
LH: loop header
LB: loop body
LE: loop exit
PB: predicated region body
PF: predicated region fallthrough
CT: control target
= control target key end

     0   :  { %12 = vsyncpa [#allocation3], 0  ;;  %s1018_s0 = inlined_call_operand.vmem [shape: bf16[2,6,4,72], index: 0, kind: input, shape index: {}]   ;;  %s1019_s1 = inlined_call_operand.vmem [shape: f32[9,4,1], index: 1, kind: input, shape index: {}]   ;;  %s1020_s2 = inlined_call_operand.vmem [shape: bf16[16,4], index: 2, kind: input, shape index: {}]   ;;  %s1021_s3 = inlined_call_operand.vmem [shape: f32[16,1], index: 3, kind: input, shape index: {}]   ;;  %s1022_s4 = inlined_call_operand.vmem [shape: bf16[8,16], index: 4, kind: input, shape index: {}]   ;;  %s1023_s5 = inlined_call_operand.vmem [shape: f32[8,4], index: 5, kind: input, shape index: {}]   ;;  %s1024_s6 = inlined_call_operand.vmem [shape: f32[8,1], index: 6, kind: input, shape index: {}]   ;;  %s1025_s7 = inlined_call_operand.hbm [shape: f32[2,8,64], index: 7, kind: output, shape index: {}]  }
   0x1   :  { %14 = vsyncpa [#allocation3 + $0x1], 0  ;;  %s861_s24 = smov 0   ;;  %s863_s25 = smov 0  }
   0x2   :  { %s865_s26 = smov 0   ;;  %s867_s27 = smov 0  }
   0x3 LB: > { %s882_s28 = sadd.s32 4294967295, %s811_s27   ;;  %s648_s29 = sadd.s32 4294967294, %s811_s27   ;;  %s811_s27 = sphi %s867_s27, %s1031_s27   ;;  %s807_s26 = sphi %s865_s26, %s1030_s26   ;;  %s803_s25 = sphi %s863_s25, %s1029_s25   ;;  %s799_s24 = sphi %s861_s24, %s1028_s24  }
   0x4   : > { %s886_s30 = sadd.s32 1, %s811_s27   ;;  %s179_s8 = sadd.s32 1, %s807_s26 }
   0x5   : > { %s176_s9 = ssub.s32 %s811_s27, %s886_s30  ;;  %p189_p0 = scmp.ne.s32.totalorder %s807_s26, %s803_s25 }
   0x6   : > { %p177_p1 = scmp.eq.s32.totalorder %s176_s9, 0  ;;  %p190_p2 = scmp.eq.s32.totalorder %s882_s28, 1 }
   0x7   : > { %p195_p3 = scmp.ne.s32.totalorder %s803_s25, %s799_s24  ;;  %p196_p4 = scmp.eq.s32.totalorder %s648_s29, 1 }
   0x8   : > { %s897_s10 = scalar_select %p177_p1, %s807_s26, %s179_s8  }
   0x9   : > { %p899_p5 = por %p190_p2, %p189_p0  ;;  %p903_p6 = por %p196_p4, %p195_p3 }
   0xa   : > { %p651_p7 = scmp.ge.s32.totalorder %s811_s27, 1  ;;  %p240_p8 = scmp.lt.s32.totalorder %s811_s27, 3 }
   0xc   : > { %p241_p9 = pnand %p651_p7, %p240_p8 }
   0xd   : > { %p272_p10 = scmp.lt.s32.totalorder (!%p241_p9), %s882_s28, 1  ;;  %s814_s22 = smov (!%p241_p9), 120  }
   0xe   : > { %244 = sbr.rel (%p241_p9) target bundleno = 1015 (0x3f7), region = 48  ;;  %s671_s23 = sshll.u32 (!%p241_p9), %s882_s28, 7 }
   0xf   : > { %s977_s14 = scalar_lea.hbm (!%p241_p9), %s1025_s7, %s671_s23  ;;  %s820_s16 = smov (!%p241_p9), [#allocation2]  }
  0x13   : > { %v666_v0 = vld [vmem:[%s1019_s1 + $0x20] sm:$0xf]  ;;  %v664_v1 = vld [vmem:[%s1019_s1 + $0x18] sm:$0xf]  ;;  %v813_v2 = vmov 0   ;;  %s273_s17 = scalar_select %p272_p10, %s882_s28, 1 }
  0x14   : > { %738 = vset.pattern.permute.xlu1 %v813_v2  ;;  %737 = vset.pattern.permute.xlu0 %v813_v2  ;;  %v665_v3 = vld [vmem:[%s1019_s1 + $0x1c] sm:$0xf]  ;;  %v280_v4 = vld [vmem:[%s1019_s1] sm:$0xf]  ;;  %v655_v5 = vld [vmem:[%s1019_s1 + $0x4] sm:$0xf] }
  0x15   : > { %377 = vperm.xlu1 %738, %v666_v0   ;;  %351 = vperm.xlu0 %737, %v664_v1   ;;  %v657_v6 = vld [vmem:[%s1019_s1 + $0x8] sm:$0xf]  ;;  %v659_v7 = vld [vmem:[%s1019_s1 + $0xc] sm:$0xf]  ;;  %v661_v8 = vld [vmem:[%s1019_s1 + $0x10] sm:$0xf] }
  0x16   : > { %v663_v9 = vld [vmem:[%s1019_s1 + $0x14] sm:$0xf]  ;;  %s690_s18 = smul.u32 12, %s273_s17  ;;  %vm386_vm0 = vcmask 519168   ;;  %v403_v52 = vld [vmem:[%s1021_s3] sm:$0xff]  ;;  %v815_v54 = vmov 2  }
  0x17   : > { %v481_v53 = vld [vmem:[%s1023_s5] sm:$0xff]  ;;  %v404_v60 = vld [vmem:[%s1021_s3 + $0x8] sm:$0xff]  ;;  %v816_v61 = vmov 1   ;;  %v817_v62 = vmov 0.0   ;;  %v818_v63 = vmov 3   ;;  %vm819_vm1 = vmmov 0  }
  0x18   : > { %s276_s21 = scalar_lea.vmem %s1018_s0, %s690_s18  ;;  %678 = vmatprep.subr.bf16.mxu0 %v817_v62  ;;  %684 = vmatprep.subr.bf16.mxu1 %v817_v62  ;;  %vm424_vm2 = vcmask 1041408   ;;  %vm420_vm3 = vcmask 31744   ;;  %vm522_vm4 = vcmask 130048   ;;  %vm573_vm5 = vcmask 523264   ;;  %s755_s17 = sshll.u32 %s820_s16, 4  ;;  %s756_s17 = int_to_ptr.vmem [resolvable:$false] %s755_s17 }
  0x19   : > { %364 = vperm.xlu0 %737, %v665_v3   ;;  %283 = vperm.xlu1 %738, %v280_v4   ;;  %v278_v10 = vld [vmem:[%s276_s21] sm:$0x3]  ;;  %v656_v11 = vld [vmem:[%s276_s21 + $0x4] sm:$0x3]  ;;  %v654_v13 = vld [vmem:[%s276_s21 + $0x2] sm:$0x3] }
  0x1a   : > { %v279_v12 = vunpack.c.l.bf16 %v278_v10  ;;  %v301_v14 = vunpack.c.l.bf16 %v656_v11  ;;  %v289_v18 = vunpack.c.l.bf16 %v654_v13  ;;  %v658_v23 = vld [vmem:[%s276_s21 + $0x6] sm:$0x3]  ;;  %v660_v26 = vld [vmem:[%s276_s21 + $0x8] sm:$0x3]  ;;  %v662_v30 = vld [vmem:[%s276_s21 + $0xa] sm:$0x3]  ;;  %680 = vmatprep.mubr.msk.bf16.mxu0 %vm819_vm1, %v817_v62  ;;  %686 = vmatprep.mubr.msk.bf16.mxu1 %vm819_vm1, %v817_v62 }
  0x1b   : > { %v313_v29 = vunpack.c.l.bf16 %v658_v23  ;;  %v943_v33 = vunpack.c.l.bf16 %v660_v26  ;;  %v337_v38 = vunpack.c.l.bf16 %v662_v30  ;;  %s269_s21 = sand.u32 1, %s803_s25   ;;  %s757_s18 = scalar_lea.vmem %s756_s17, 256 }
  0x1c   : > { %s576_s28 = scalar_lea.sflag [#allocation3], %s269_s21 }
  0x1d   : > { %294 = vperm.xlu0 %737, %v655_v5   ;;  %306 = vperm.xlu1 %738, %v657_v6  }
  0x21   : > { %318 = vperm.xlu0 %737, %v659_v7   ;;  %330 = vperm.xlu1 %738, %v661_v8   ;;  %v744_v8 = vld [vmem:[%s1020_s2] sm:$0xff]  }
  0x25   : > { %342 = vperm.xlu0 %737, %v663_v9  }
  0x90   : > { %v378_v15 = vpop.permute.xlu1 %377  ;;  %v352_v16 = vpop.permute.xlu0 %351 }
  0x91   : > { %v354_v17 = vmul.f32 %v352_v16, %v279_v12  ;;  %v380_v19 = vmul.f32 %v378_v15, %v301_v14 }
  0x93   : > { %356 = vrot.lane.b32.xlu1 %v354_v17, %s814_s22 }
  0x94   : > { %v365_v20 = vpop.permute.xlu0 %364  ;;  %v284_v21 = vpop.permute.xlu1 %283 }
  0x95   : > { %v367_v22 = vmul.f32 %v365_v20, %v289_v18  ;;  %v286_v27 = vmul.f32 %v284_v21, %v279_v12 }
  0x97   : > { %369 = vrot.lane.b32.xlu0 %v367_v22, %s814_s22  ;;  %382 = vrot.lane.b32.xlu1 %v380_v19, %s814_s22  ;;  %s652_s22 = sshll.u32 %s269_s21, 3 }
  0x98   : > { %v295_v24 = vpop.permute.xlu0 %294  ;;  %v307_v25 = vpop.permute.xlu1 %306  ;;  %s271_s29 = scalar_lea.vmem [#allocation2], %s652_s22 }
  0x99   : > { %v297_v28 = vmul.f32 %v295_v24, %v289_v18  ;;  %v309_v32 = vmul.f32 %v307_v25, %v301_v14  ;;  %s589_s8 = sshll.u32 %s271_s29, 4  ;;  %s979_s8 = int_to_ptr.vmem [resolvable:$true] %s589_s8 }
  0x9a   : > { %s751_s15 = scalar_lea.vmem %s979_s8, 128  ;;  %p758_p0 = scmp.lt.s32.totalorder %s979_s8, %s756_s17 }
  0x9b   : > { %v298_v31 = vadd.f32 %v297_v28, %v286_v27  ;;  %v479_v28 = vld [vmem:[%s1022_s4] sm:$0xf]  ;;  %p752_p11 = scmp.ne.s32.totalorder %s979_s8, %s751_s15  ;;  %p759_p1 = scmp.lt.s32.totalorder %s757_s18, %s751_s15 }
  0x9c   : > { %v319_v34 = vpop.permute.xlu0 %318  ;;  %v331_v35 = vpop.permute.xlu1 %330 }
  0x9d   : > { %v310_v36 = vadd.f32 %v309_v32, %v298_v31  ;;  %v321_v37 = vmul.f32 %v319_v34, %v313_v29  ;;  %v333_v40 = vmul.f32 %v331_v35, %v943_v33  ;;  %v487_v29 = vlaneseq  ;;  %p753_p12 = pnand %p752_p11, %p899_p5  ;;  %p760_p2 = por %p759_p1, %p758_p0 }
  0x9f   : > { %v322_v39 = vadd.f32 %v321_v37, %v310_v36  ;;  %v488_v30 = vshrl.u32 %v487_v29, 7  ;;  %p754_p13 = pneg %p753_p12 }
  0xa0   : > { %v343_v41 = vpop.permute.xlu0 %342 }
  0xa1   : > { %v334_v42 = vadd.f32 %v333_v40, %v322_v39  ;;  %v345_v43 = vmul.f32 %v343_v41, %v337_v38  ;;  %v498_v31 = vsub.s32 1, %v488_v30  ;;  %v489_v32 = vsub.s32 0, %v488_v30  ;;  %p761_p3 = pnand %p760_p2, %p754_p13 }
  0xa2   : > { %v508_v35 = vsub.s32 2, %v488_v30  ;;  %v518_v41 = vsub.s32 3, %v488_v30 }
  0xa3   : > { %v346_v44 = vadd.f32 %v345_v43, %v334_v42  ;;  %v499_v34 = vrot.slane %v943_v33, %v498_v31  ;;  %v490_v38 = vrot.slane %v943_v33, %v489_v32 }
  0xa4   : > { %v509_v40 = vrot.slane %v943_v33, %v508_v35 }
 0x105   : > { %v357_v45 = vpop.permute.xlu1 %356 }
 0x106   : > { %v359_v46 = vadd.f32 %v357_v45, %v346_v44 }
 0x109   : > { %v370_v47 = vpop.permute.xlu0 %369  ;;  %v383_v48 = vpop.permute.xlu1 %382 }
 0x10a   : > { %v372_v49 = vadd.f32 %v370_v47, %v359_v46  ;;  %v519_v46 = vrot.slane %v943_v33, %v518_v41 }
 0x10c   : > { %v385_v50 = vadd.f32 %v383_v48, %v372_v49 }
 0x10e   : > { %v387_v51 = vsel %vm386_vm0, %v385_v50, 0.0 }
 0x10f   : > { %388 = vadd.xlane.f32.xlu0 %v387_v51 }
 0x125   : > { %407 = vperm.xlu0 %737, %v403_v52  }
 0x129   : > { %484 = vperm.xlu0 %737, %v481_v53  }
 0x12d   : > { %740 = vset.pattern.permute.xlu0 %v815_v54 }
 0x12e   : > { %503 = vperm.xlu0 %740, %v481_v53  }
 0x132   : > { %743 = vset.pattern.permute.xlu0 %v813_v2 }
 0x198   : > { %v389_v55 = vpop.xlane.xlu0 %388 }
 0x199   : > { %v390_v56 = vmul.f32 0.015625, %v389_v55 }
 0x19b   : > { %v391_v57 = vsub.f32 %v385_v50, %v390_v56 }
 0x19d   : > { %v392_v58 = vmul.f32 %v391_v57, %v391_v57 }
 0x19f   : > { %v393_v59 = vsel %vm386_vm0, %v392_v58, 0.0 }
 0x1a0   : > { %394 = vadd.xlane.f32.xlu1 %v393_v59  ;;  %v408_v9 = vpop.permute.xlu0 %407 }
 0x1a4   : > { %v485_v36 = vpop.permute.xlu0 %484 }
 0x1a5   : > { %v491_v43 = vmul.f32 %v490_v38, %v485_v36 }
 0x1a9   : > { %v504_v42 = vpop.permute.xlu0 %503 }
 0x1aa   : > { %v510_v45 = vmul.f32 %v509_v40, %v504_v42 }
 0x1b1   : > { %412 = vperm.xlu1 %738, %v404_v60  }
 0x1b5   : > { %739 = vset.pattern.permute.xlu1 %v816_v61 }
 0x1b6   : > { %493 = vperm.xlu1 %739, %v481_v53  }
 0x1ba   : > { %741 = vset.pattern.permute.xlu1 %v818_v63 }
 0x1bb   : > { %513 = vperm.xlu1 %741, %v481_v53  }
 0x1bf   : > { %742 = vset.pattern.permute.xlu1 %v813_v2  ;;  %v566_v2 = vld [vmem:[%s1024_s6] sm:$0xff] }
 0x1c0   : > { %569 = vperm.xlu1 %742, %v566_v2  }
 0x229   : > { %v395_v0 = vpop.xlane.xlu1 %394 }
 0x22a   : > { %v396_v1 = vmul.f32 0.015625, %v395_v0 }
 0x22c   : > { %v397_v3 = vadd.f32 1e-05, %v396_v1 }
 0x22d   : > { %v413_v14 = vpop.permute.xlu1 %412 }
 0x22e   : > { %745 = vrsqrt.f32 %v397_v3 }
 0x231   : > { %v494_v37 = vpop.permute.xlu1 %493 }
 0x232   : > { %v500_v39 = vmul.f32 %v499_v34, %v494_v37 }
 0x234   : > { %v501_v44 = vadd.f32 %v500_v39, %v491_v43 }
 0x236   : > { %v514_v47 = vpop.permute.xlu1 %513  ;;  %v511_v48 = vadd.f32 %v510_v45, %v501_v44 }
 0x237   : > { %v520_v49 = vmul.f32 %v519_v46, %v514_v47 }
 0x239   : > { %v521_v50 = vadd.f32 %v520_v49, %v511_v48 }
 0x23b   : > { %v746_v4 = vpop.eup %745  ;;  %v570_v52 = vpop.permute.xlu1 %569 }
 0x23c   : > { %v399_v5 = vmul.f32 %v746_v4, %v391_v57 }
 0x23e   : > { %v402_v6 = vpack.c.bf16 %v399_v5, %v399_v5 }
 0x240   : > { %v426_v7 = vsel %vm424_vm2, %v402_v6, 0 }
 0x241   : > { %679 = vmatpush3.bf16.msra.mxu0 %v426_v7 }
 0x244   : > { %681 = vmatmul.mubr.msk.bf16.vlgmr.msra.gmra.mxu0 %vm420_vm3, %v744_v8 }
 0x304   : > { %v462_v10 = vpop.f32.mrf.mxu0 }
 0x305   : > { %v463_v11 = vadd.f32 %v462_v10, %v408_v9 }
 0x306   : > { %v682_v12 = vpop.f32.mrf.mxu0 }
 0x307   : > { %v471_v13 = vmul.f32 0.70710677, %v463_v11  ;;  %v469_v22 = vmul.f32 0.5, %v463_v11 }
 0x308   : > { %v465_v15 = vpop.f32.mrf.mxu0 }
 0x309   : > { %747 = verf.f32 %v471_v13  ;;  %v466_v16 = vadd.f32 %v465_v15, %v413_v14 }
 0x30a   : > { %v683_v17 = vpop.f32.mrf.mxu0 }
 0x30b   : > { %v472_v18 = vmul.f32 0.70710677, %v466_v16  ;;  %v470_v23 = vmul.f32 0.5, %v466_v16 }
 0x30d   : > { %749 = verf.f32 %v472_v18 }
 0x316   : > { %v748_v19 = vpop.eup %747 }
 0x317   : > { %v475_v20 = vadd.f32 1.0, %v748_v19 }
 0x319   : > { %v477_v25 = vmul.f32 %v475_v20, %v469_v22 }
 0x31a   : > { %v750_v21 = vpop.eup %749 }
 0x31b   : > { %v476_v24 = vadd.f32 1.0, %v750_v21 }
 0x31d   : > { %v478_v26 = vmul.f32 %v476_v24, %v470_v23 }
 0x31f   : > { %v480_v27 = vpack.c.bf16 %v478_v26, %v477_v25 }
 0x321   : > { %685 = vmatpush3.bf16.msra.mxu1 %v480_v27 }
 0x324   : > { %687 = vmatmul.mubr.msk.bf16.vlgmr.msra.gmra.mxu1 %vm522_vm4, %v479_v28 }
 0x3e4   : > { %v560_v51 = vpop.f32.mrf.mxu1 }
 0x3e5   : > { %v561_v53 = vadd.f32 %v560_v51, %v521_v50 }
 0x3e6   : > { %v688_v54 = vpop.f32.mrf.mxu1 }
 0x3e7   : > { %v572_v55 = vadd.f32 %v570_v52, %v561_v53 }
 0x3e8   : > { %v563_v33 = vpop.f32.mrf.mxu1 }
 0x3e9   : > { %574 = vst.msk [vmem:[%s271_s29] sm:$0xff] %vm573_vm5, %v572_v55 }
 0x3ea   : > { %v689_v56 = vpop.f32.mrf.mxu1 }
 0x3eb   : > { %764 = shalt.err (!%p761_p3)
}
 0x3ec   : > { %s765_s19 = scalar_lea.hbm %s977_s14, 128  ;;  %s769_s22 = scalar_lea.hbm %s1025_s7, 256 }
 0x3ed   : > { %p766_p4 = scmp.ne.s32.totalorder %s977_s14, %s765_s19  ;;  %p770_p9 = scmp.lt.s32.totalorder %s977_s14, %s1025_s7 }
 0x3ee   : > { %p771_p10 = scmp.lt.s32.totalorder %s769_s22, %s765_s19 }
 0x3ef   : > { %p767_p7 = pnand %p766_p4, %p899_p5 }
 0x3f0   : > { %p772_p11 = por %p771_p10, %p770_p9 }
 0x3f1   : > { %p768_p8 = pneg %p767_p7 }
 0x3f3   : > { %p773_p12 = pnand %p772_p11, %p768_p8 }
 0x3f5   : > { %776 = shalt.err (!%p773_p12)
}
 0x3f6   : > { %691 = dma.vmem_to_hbm [thread:$0]  (%p899_p5), %s979_s8, 128, %s977_s14, %s576_s28  }
 0x3f7 PF: > { %p697_p13 = scmp.ge.s32.totalorder %s811_s27, 2  ;;  %s601_s9 = sand.u32 1, %s799_s24  }
 0x3f8   : > { %s602_s13 = scalar_lea.sflag [#allocation3], %s601_s9 }
 0x3f9   : > { %p694_p0 = pnand %p697_p13, %p903_p6 }
 0x3fb   : > { %p695_p1 = pneg %p694_p0 }
 0x3fd   : > { %794 = dma.done.wait (%p695_p1), %s602_s13, 128  }
 0x3fe   : > { %796 = vsyncadd (%p695_p1), %s602_s13, 4294967168  ;;  %p17_p2 = scmp.ge.s32.totalorder %s886_s30, 4   ;;  %s1028_s24 = smov %s803_s25 }
 0x3ff   : > { %s1029_s25 = smov %s807_s26  ;;  %s1030_s26 = smov %s897_s10 }
 0x400   : > { %s1031_s27 = smov %s886_s30  ;;  %19 = sbr.rel (!%p17_p2) target bundleno = 3 (0x3), region = 96 }
 0x405   :  { %607 = vsyncpa [#allocation3], 1 }
 0x406   :  { %609 = vsyncpa [#allocation3 + $0x1], 1 }

</bundles_post_ra>
